<compile_context>
chip_gen: v7x
topology: tpu7x:2x2x1
jax: 0.10.0
libtpu: 0.0.40
codegen_flags: <defaults>
</compile_context>

<pallas_src>
import functools

import jax
import jax.numpy as jnp
from jax.experimental import pallas as pl
from jax.experimental.pallas import tpu as pltpu


def _round_up(x, m):
    return ((x + m - 1) // m) * m


# ----------------------------------------------------------------------------
# Fused matmul + bias + optional residual + optional ReLU
#   -- 1x1 convs, strided convs (via im2col) and the embed Linear.
# ----------------------------------------------------------------------------
def _mm_kernel_single_k(*refs, relu, has_res):
    # Whole contraction fits in one K tile: no accumulator scratch needed.
    if has_res:
        a_ref, b_ref, bias_ref, res_ref, o_ref = refs
    else:
        a_ref, b_ref, bias_ref, o_ref = refs
        res_ref = None
    y = jnp.dot(a_ref[...], b_ref[...], preferred_element_type=jnp.float32)
    y = y + bias_ref[...]
    if res_ref is not None:
        y = y + res_ref[...].astype(jnp.float32)
    if relu:
        y = jnp.maximum(y, 0.0)
    o_ref[...] = y.astype(o_ref.dtype)


def _mm_kernel_multi_k(*refs, relu, has_res):
    if has_res:
        a_ref, b_ref, bias_ref, res_ref, o_ref, acc_ref = refs
    else:
        a_ref, b_ref, bias_ref, o_ref, acc_ref = refs
        res_ref = None
    k = pl.program_id(2)

    @pl.when(k == 0)
    def _():
        acc_ref[...] = jnp.zeros_like(acc_ref)

    acc_ref[...] += jnp.dot(a_ref[...], b_ref[...],
                            preferred_element_type=jnp.float32)

    @pl.when(k == pl.num_programs(2) - 1)
    def _():
        y = acc_ref[...] + bias_ref[...]
        if res_ref is not None:
            y = y + res_ref[...].astype(jnp.float32)
        if relu:
            y = jnp.maximum(y, 0.0)
        o_ref[...] = y.astype(o_ref.dtype)


@functools.partial(jax.jit, static_argnames=("relu", "out_dtype"))
def fused_matmul(a, b, bias, residual=None, *, relu, out_dtype=jnp.bfloat16):
    """(M,K) @ (K,N) + bias[N] (+ residual[M,N]), optional ReLU. bf16 MXU, fp32 acc."""
    M, K = a.shape
    K2, N = b.shape
    assert K == K2
    a = a.astype(jnp.bfloat16)
    b = b.astype(jnp.bfloat16)
    bias = bias.astype(jnp.float32)

    # M: single tile up to 512 (small-M / weight-DMA-bound regime), pad to >=16 for bf16.
    if M <= 512:
        Mp = max(_round_up(M, 16), 16)
        tm = Mp
    else:
        Mp = _round_up(M, 512)
        tm = 512

    # K: keep the full contraction in one tile when it fits (<=2048).
    if K % 128 == 0:
        Kp = K
    elif K < 128:
        Kp = _round_up(K, 8)
    else:
        Kp = _round_up(K, 128)
    if Kp <= 2048:
        tk = Kp
    else:
        tk = next(t for t in (2048, 1024, 512, 256, 128) if Kp % t == 0)

    # N: lane-dense (>=128) tiles, single weight fetch when possible.
    Np = max(_round_up(N, 128), 128)
    tn = Np if Np <= 512 else (512 if Np % 512 == 0 else (256 if Np % 256 == 0 else 128))

    # Give a second TensorCore (v7x) work when everything would collapse to one grid step.
    if Mp // tm == 1 and Np // tn == 1 and Kp // tk == 1 and Mp >= 256 and Mp % 32 == 0:
        tm = Mp // 2

    if (Mp, Kp) != (M, K):
        a = jnp.pad(a, ((0, Mp - M), (0, Kp - K)))
    if (Kp, Np) != (K, N):
        b = jnp.pad(b, ((0, Kp - K), (0, Np - N)))
    if Np != N:
        bias = jnp.pad(bias, ((0, Np - N),))
    bias = bias.reshape(1, Np)

    has_res = residual is not None
    args = [a, b, bias]
    in_specs = [
        pl.BlockSpec((tm, tk), lambda i, j, k: (i, k)),
        pl.BlockSpec((tk, tn), lambda i, j, k: (k, j)),
        pl.BlockSpec((1, tn), lambda i, j, k: (0, j)),
    ]
    if has_res:
        residual = residual.astype(jnp.bfloat16)
        if residual.shape != (Mp, Np):
            residual = jnp.pad(residual, ((0, Mp - M), (0, Np - N)))
        args.append(residual)
        in_specs.append(pl.BlockSpec((tm, tn), lambda i, j, k: (i, j)))

    nk = Kp // tk
    grid = (Mp // tm, Np // tn, nk)
    if nk == 1:
        kernel = functools.partial(_mm_kernel_single_k, relu=relu, has_res=has_res)
        scratch = []
    else:
        kernel = functools.partial(_mm_kernel_multi_k, relu=relu, has_res=has_res)
        scratch = [pltpu.VMEM((tm, tn), jnp.float32)]

    out = pl.pallas_call(
        kernel,
        out_shape=jax.ShapeDtypeStruct((Mp, Np), out_dtype),
        grid=grid,
        in_specs=in_specs,
        out_specs=pl.BlockSpec((tm, tn), lambda i, j, k: (i, j)),
        scratch_shapes=scratch,
        compiler_params=pltpu.CompilerParams(
            dimension_semantics=("parallel", "parallel", "arbitrary"),
            vmem_limit_bytes=48 << 20,
        ),
    )(*args)
    if (Mp, Np) != (M, N):
        out = out[:M, :N]
    return out


# ----------------------------------------------------------------------------
# Stride-1 kxk conv + folded-BN bias + (optional) ReLU.
# Whole padded image per (cout_tile, image) grid step; the kh*kw taps are accumulated
# as (Ho*Wo, Cin) @ (Cin, tn) MXU matmuls into an fp32 VMEM scratch.
# ----------------------------------------------------------------------------
def _conv_s1_kernel(x_ref, w_ref, b_ref, o_ref, acc_ref, *, kh, kw, relu):
    # x_ref:  (1, Hp, Wp, Cin)   padded image (VMEM block)
    # w_ref:  (kh*kw*Cin, tn)    folded conv weights
    # b_ref:  (1, tn)            folded BN bias
    # o_ref:  (1, Ho*Wo, tn)     output, spatial flattened (lane-dense)
    # acc_ref:(Ho*Wo, tn) f32
    cin = x_ref.shape[-1]
    hp, wp = x_ref.shape[1], x_ref.shape[2]
    ho, wo = hp - kh + 1, wp - kw + 1

    acc_ref[...] = jnp.zeros_like(acc_ref)
    for i in range(kh):
        for j in range(kw):
            a = x_ref[0, i:i + ho, j:j + wo, :].reshape(ho * wo, cin)      # (Ho*Wo, Cin)
            wtap = w_ref[(i * kw + j) * cin:(i * kw + j + 1) * cin, :]     # (Cin, tn)
            acc_ref[...] += jnp.dot(a, wtap, preferred_element_type=jnp.float32)

    y = acc_ref[...] + b_ref[...]
    if relu:
        y = jnp.maximum(y, 0.0)
    o_ref[0] = y.astype(o_ref.dtype)


@functools.partial(jax.jit, static_argnames=("kh", "kw", "pad", "relu"))
def conv_s1_bn_act(x, w_mat, bias, *, kh, kw, pad, relu):
    N, H, W, Cin = x.shape
    KK, Cout = w_mat.shape
    assert KK == kh * kw * Cin

    # Lane-dense output channels (pad Cout=64 -> 128; slice back afterwards).
    Cp = max(_round_up(Cout, 128), 128)
    w = w_mat.astype(jnp.bfloat16)
    b = bias.astype(jnp.float32)
    if Cp != Cout:
        w = jnp.pad(w, ((0, 0), (0, Cp - Cout)))
        b = jnp.pad(b, ((0, Cp - Cout),))
    b = b.reshape(1, Cp)
    tn = Cp if Cp <= 512 else (512 if Cp % 512 == 0 else 256)

    xp = jnp.pad(x.astype(jnp.bfloat16), ((0, 0), (pad, pad), (pad, pad), (0, 0)))
    Hp, Wp = H + 2 * pad, W + 2 * pad
    Ho, Wo = Hp - kh + 1, Wp - kw + 1

    out = pl.pallas_call(
        functools.partial(_conv_s1_kernel, kh=kh, kw=kw, relu=relu),
        out_shape=jax.ShapeDtypeStruct((N, Ho * Wo, Cp), jnp.bfloat16),
        grid=(Cp // tn, N),   # cout tile outermost => weight block stays VMEM-resident
        in_specs=[
            pl.BlockSpec((1, Hp, Wp, Cin), lambda co, n: (n, 0, 0, 0)),
            pl.BlockSpec((KK, tn), lambda co, n: (0, co)),
            pl.BlockSpec((1, tn), lambda co, n: (0, co)),
        ],
        out_specs=pl.BlockSpec((1, Ho * Wo, tn), lambda co, n: (n, 0, co)),
        scratch_shapes=[pltpu.VMEM((Ho * Wo, tn), jnp.float32)],
        compiler_params=pltpu.CompilerParams(
            dimension_semantics=("parallel", "parallel"),
            vmem_limit_bytes=48 << 20,
        ),
    )(xp, w, b)
    out = out.reshape(N, Ho, Wo, Cp)
    return out[..., :Cout] if Cp != Cout else out


# ----------------------------------------------------------------------------
# Conv wrappers (1x1 and strided kxk via im2col), all feeding the fused matmul.
# ----------------------------------------------------------------------------
def conv1x1_bn_act(x, w_mat, bias, *, stride=1, relu=True, residual=None):
    if stride > 1:
        x = x[:, ::stride, ::stride, :]
    N, H, W, C = x.shape
    Cout = w_mat.shape[1]
    res = residual.reshape(N * H * W, Cout) if residual is not None else None
    y = fused_matmul(x.reshape(N * H * W, C), w_mat, bias, residual=res,
                     relu=relu, out_dtype=jnp.bfloat16)
    return y.reshape(N, H, W, Cout)


def conv_im2col_bn_act(x, w_mat, bias, kh, kw, stride, pad, *, relu):
    # Only for the strided convs (stem 7x7/2 and the three 3x3/2 convs).
    N, H, W, Cin = x.shape
    xp = jnp.pad(x.astype(jnp.bfloat16), ((0, 0), (pad, pad), (pad, pad), (0, 0)))
    Ho = (H + 2 * pad - kh) // stride + 1
    Wo = (W + 2 * pad - kw) // stride + 1
    cols = []
    for i in range(kh):
        for j in range(kw):
            cols.append(xp[:, i:i + Ho * stride:stride, j:j + Wo * stride:stride, :])
    patches = jnp.concatenate(cols, axis=-1).reshape(N * Ho * Wo, kh * kw * Cin)
    y = fused_matmul(patches, w_mat, bias, relu=relu, out_dtype=jnp.bfloat16)
    return y.reshape(N, Ho, Wo, -1)


# ----------------------------------------------------------------------------
# Elementwise kernels: max-of-3 (separable maxpool), global avg pool.
# Gridded over the batch dimension (bounded VMEM, pipelined across images).
# ----------------------------------------------------------------------------
def _max3_kernel(a_ref, b_ref, c_ref, o_ref):
    a = a_ref[...].astype(jnp.float32)
    b = b_ref[...].astype(jnp.float32)
    c = c_ref[...].astype(jnp.float32)
    o_ref[...] = jnp.maximum(jnp.maximum(a, b), c).astype(o_ref.dtype)


@jax.jit
def _max3(a, b, c):
    N, H, W, C = a.shape
    blk = (1, H, W, C)
    return pl.pallas_call(
        _max3_kernel,
        out_shape=jax.ShapeDtypeStruct(a.shape, a.dtype),
        grid=(N,),
        in_specs=[pl.BlockSpec(blk, lambda n: (n, 0, 0, 0))] * 3,
        out_specs=pl.BlockSpec(blk, lambda n: (n, 0, 0, 0)),
        compiler_params=pltpu.CompilerParams(dimension_semantics=("parallel",)),
    )(a, b, c)


def maxpool2d_3x3_s2(x):
    """3x3 stride-2 pad-1 maxpool, done separably (width pass, then height pass)."""
    # Note: assumes a floating-point dtype (the -inf pad value).
    N, H, W, C = x.shape
    Ho = (H + 2 - 3) // 2 + 1
    Wo = (W + 2 - 3) // 2 + 1
    xp = jnp.pad(x, ((0, 0), (1, 1), (1, 1), (0, 0)), constant_values=-jnp.inf)
    xw = _max3(xp[:, :, 0:2 * Wo - 1:2, :],
               xp[:, :, 1:2 * Wo:2, :],
               xp[:, :, 2:2 * Wo + 1:2, :])
    return _max3(xw[:, 0:2 * Ho - 1:2, :, :],
                 xw[:, 1:2 * Ho:2, :, :],
                 xw[:, 2:2 * Ho + 1:2, :, :])


def _gap_kernel(x_ref, o_ref, *, inv):
    x = x_ref[0].astype(jnp.float32)            # (H, W, C)
    s = jnp.sum(x, axis=0)                      # (W, C)
    s = jnp.sum(s, axis=0, keepdims=True)       # (1, C)
    o_ref[0] = s * inv


@jax.jit
def global_avg_pool(x):
    """x: (N, H, W, C) -> (N, C)  (== AdaptiveAvgPool2d((1,1)) + flatten)."""
    N, H, W, C = x.shape
    out = pl.pallas_call(
        functools.partial(_gap_kernel, inv=1.0 / float(H * W)),
        out_shape=jax.ShapeDtypeStruct((N, 1, C), jnp.float32),
        grid=(N,),
        in_specs=[pl.BlockSpec((1, H, W, C), lambda n: (n, 0, 0, 0))],
        out_specs=pl.BlockSpec((1, 1, C), lambda n: (n, 0, 0)),
        compiler_params=pltpu.CompilerParams(dimension_semantics=("parallel",)),
    )(x)
    return out.reshape(N, C)


# ----------------------------------------------------------------------------
# ResNet50 backbone + embed (EncoderCNN.forward)
# ----------------------------------------------------------------------------
def bottleneck(x, blk):
    out = conv1x1_bn_act(x, blk["w1"], blk["b1"], stride=1, relu=True)
    if blk["stride"] == 1:
        out = conv_s1_bn_act(out, blk["w2"], blk["b2"], kh=3, kw=3, pad=1, relu=True)
    else:
        out = conv_im2col_bn_act(out, blk["w2"], blk["b2"], 3, 3, blk["stride"], 1, relu=True)
    if "wd" in blk:
        identity = conv1x1_bn_act(x, blk["wd"], blk["bd"],
                                  stride=blk["stride"], relu=False)
    else:
        identity = x
    # conv3 + BN + residual add + ReLU fused into one matmul epilogue.
    return conv1x1_bn_act(out, blk["w3"], blk["b3"], stride=1, relu=True,
                          residual=identity)


def encoder_cnn_forward(params, images_nchw):
    """images_nchw: (N, 3, H, W) float32 (PyTorch NCHW convention)."""
    x = jnp.transpose(images_nchw, (0, 2, 3, 1)).astype(jnp.bfloat16)   # NHWC, bf16
    x = conv_im2col_bn_act(x, params["conv1_w"], params["conv1_b"], 7, 7, 2, 3, relu=True)
    x = maxpool2d_3x3_s2(x)
    for blocks in params["stages"]:
        for blk in blocks:
            x = bottleneck(x, blk)
    feats = global_avg_pool(x)                                          # (N, 2048) f32
    return fused_matmul(feats, params["embed_w"], params["embed_b"],
                        relu=False, out_dtype=jnp.float32)              # (N, embed)


# ----------------------------------------------------------------------------
# Deterministic parameters (same shapes as torchvision resnet50) + BN folding.
# ----------------------------------------------------------------------------
def init_conv(key, kh, kw, cin, cout):
    std = (2.0 / (kh * kw * cin)) ** 0.5
    return jax.random.normal(key, (kh * kw * cin, cout), jnp.float32) * std


def init_bn(key, c):
    k1, k2, k3, k4 = jax.random.split(key, 4)
    gamma = 1.0 + 0.1 * jax.random.normal(k1, (c,), jnp.float32)
    beta = 0.1 * jax.random.normal(k2, (c,), jnp.float32)
    mean = 0.1 * jax.random.normal(k3, (c,), jnp.float32)
    var = 1.0 + 0.1 * jax.random.uniform(k4, (c,), jnp.float32)
    return (gamma, beta, mean, var)


def make_params(key, embed_size):
    keys = iter(jax.random.split(key, 512))
    p = {"conv1": init_conv(next(keys), 7, 7, 3, 64), "bn1": init_bn(next(keys), 64)}
    in_c = 64
    stages = []
    for (width, n_blocks, stride) in [(64, 3, 1), (128, 4, 2), (256, 6, 2), (512, 3, 2)]:
        blocks = []
        for b in range(n_blocks):
            s = stride if b == 0 else 1
            out_c = width * 4
            blk = {
                "conv1": init_conv(next(keys), 1, 1, in_c, width),
                "bn1": init_bn(next(keys), width),
                "conv2": init_conv(next(keys), 3, 3, width, width),
                "bn2": init_bn(next(keys), width),
                "conv3": init_conv(next(keys), 1, 1, width, out_c),
                "bn3": init_bn(next(keys), out_c),
                "stride": s,
            }
            if s != 1 or in_c != out_c:
                blk["down_conv"] = init_conv(next(keys), 1, 1, in_c, out_c)
                blk["down_bn"] = init_bn(next(keys), out_c)
            blocks.append(blk)
            in_c = out_c
        stages.append(blocks)
    p["stages"] = stages
    kw_, kb_ = jax.random.split(next(keys), 2)
    bound = 1.0 / (2048.0 ** 0.5)
    p["embed_w"] = jax.random.uniform(kw_, (2048, embed_size), jnp.float32, -bound, bound)
    p["embed_b"] = jax.random.uniform(kb_, (embed_size,), jnp.float32, -bound, bound)
    return p


def fold_bn(w_mat, bn, eps=1e-5):
    """Fold eval-mode BN into the conv: w' = w*scale (per Cout col), bias = beta - mean*scale."""
    gamma, beta, mean, var = bn
    scale = gamma / jnp.sqrt(var + eps)
    shift = beta - mean * scale
    return (w_mat * scale[None, :]).astype(jnp.bfloat16), shift.astype(jnp.float32)


def fold_params(raw):
    p = {}
    p["conv1_w"], p["conv1_b"] = fold_bn(raw["conv1"], raw["bn1"])
    stages = []
    for blocks in raw["stages"]:
        fblocks = []
        for blk in blocks:
            d = {"stride": blk["stride"]}
            d["w1"], d["b1"] = fold_bn(blk["conv1"], blk["bn1"])
            d["w2"], d["b2"] = fold_bn(blk["conv2"], blk["bn2"])
            d["w3"], d["b3"] = fold_bn(blk["conv3"], blk["bn3"])
            if "down_conv" in blk:
                d["wd"], d["bd"] = fold_bn(blk["down_conv"], blk["down_bn"])
            fblocks.append(d)
        stages.append(fblocks)
    p["stages"] = stages
    p["embed_w"] = raw["embed_w"].astype(jnp.bfloat16)
    p["embed_b"] = raw["embed_b"].astype(jnp.float32)
    return p


if __name__ == "__main__":
    key = jax.random.PRNGKey(0)
    k_params, k_img = jax.random.split(key)

    embed_size = 256
    raw_params = make_params(k_params, embed_size)
    params = fold_params(raw_params)

    # Small deterministic input, PyTorch NCHW: (batch=2, channels=3, 64, 64).
    images = jax.random.normal(k_img, (2, 3, 64, 64), jnp.float32)

    out = encoder_cnn_forward(params, images)
    out = jax.block_until_ready(out)

    assert out.shape == (2, embed_size), out.shape
    assert out.dtype == jnp.float32
    assert bool(jnp.all(jnp.isfinite(out)))
    print("KERNEL_OK")
</pallas_src>

<mosaic_0001>
module attributes {stable_mosaic.version = 11 : i64} {
  func.func @_mm_kernel_single_k(%arg0: i32, %arg1: i32, %arg2: i32, %arg3: memref<512x256xbf16, #tpu.memory_space<vmem>>, %arg4: memref<256x128xbf16, #tpu.memory_space<vmem>>, %arg5: memref<1x128xf32, #tpu.memory_space<vmem>>, %arg6: memref<512x128xbf16, #tpu.memory_space<vmem>>) attributes {dimension_semantics = [#tpu.dimension_semantics<parallel>, #tpu.dimension_semantics<parallel>, #tpu.dimension_semantics<arbitrary>], iteration_bounds = array<i64: 4, 1, 1>, scalar_prefetch = 0 : i64, scratch_operands = 0 : i64, tpu.core_type = #tpu.core_type<tc>, window_params = [{transform_indices = @transform_0, window_bounds = array<i64: 512, 256>}, {transform_indices = @transform_1, window_bounds = array<i64: 256, 128>}, {transform_indices = @transform_2, window_bounds = array<i64: 1, 128>}, {transform_indices = @transform_3, window_bounds = array<i64: 512, 128>}]} {
    %c0 = arith.constant 0 : index
    %c0_0 = arith.constant 0 : index
    %0 = vector.load %arg3[%c0, %c0_0] : memref<512x256xbf16, #tpu.memory_space<vmem>>, vector<512x256xbf16>
    %c0_1 = arith.constant 0 : index
    %c0_2 = arith.constant 0 : index
    %1 = vector.load %arg4[%c0_1, %c0_2] : memref<256x128xbf16, #tpu.memory_space<vmem>>, vector<256x128xbf16>
    %cst = arith.constant dense<0.000000e+00> : vector<512x128xf32>
    %2 = tpu.matmul %0, %1, %cst {dimension_numbers = #tpu.dot_dimension_numbers<[1], [0], [0], [1], [0, 0, 1, 1], [], []>} : vector<512x256xbf16>, vector<256x128xbf16>, vector<512x128xf32> -> vector<512x128xf32>
    %c0_3 = arith.constant 0 : index
    %c0_4 = arith.constant 0 : index
    %3 = vector.load %arg5[%c0_3, %c0_4] : memref<1x128xf32, #tpu.memory_space<vmem>>, vector<1x128xf32>
    %4 = vector.broadcast %3 : vector<1x128xf32> to vector<512x128xf32>
    %5 = arith.addf %2, %4 : vector<512x128xf32>
    %cst_5 = arith.constant 0.000000e+00 : f32
    %6 = vector.broadcast %cst_5 : f32 to vector<512x128xf32>
    %7 = arith.maximumf %5, %6 : vector<512x128xf32>
    %8 = arith.truncf %7 : vector<512x128xf32> to vector<512x128xbf16>
    %c0_6 = arith.constant 0 : index
    %c0_7 = arith.constant 0 : index
    %9 = vector.load %arg6[%c0_6, %c0_7] : memref<512x128xbf16, #tpu.memory_space<vmem>>, vector<512x128xbf16>
    tpu.vector_store %arg6[%c0_6, %c0_7], %8 {strides = array<i32>} : memref<512x128xbf16, #tpu.memory_space<vmem>>, vector<512x128xbf16>,
    return
  }
  func.func @transform_0(%arg0: i32, %arg1: i32, %arg2: i32) -> (i32, i32) {
    %c0_i32 = arith.constant 0 : i32
    return %arg0, %arg2 : i32, i32
  }
  func.func @transform_1(%arg0: i32, %arg1: i32, %arg2: i32) -> (i32, i32) {
    %c0_i32 = arith.constant 0 : i32
    return %arg2, %arg1 : i32, i32
  }
  func.func @transform_2(%arg0: i32, %arg1: i32, %arg2: i32) -> (i32, i32) {
    %c0_i32 = arith.constant 0 : i32
    %c0_i32_0 = arith.constant 0 : i32
    return %c0_i32, %arg1 : i32, i32
  }
  func.func @transform_3(%arg0: i32, %arg1: i32, %arg2: i32) -> (i32, i32) {
    %c0_i32 = arith.constant 0 : i32
    return %arg0, %arg1 : i32, i32
  }
}

</mosaic_0001>

<bundles_post_ra>
// kernel: fused_matmul.1
= control target key start
LH: loop header
LB: loop body
LE: loop exit
PB: predicated region body
PF: predicated region fallthrough
CT: control target
= control target key end

     0   :  { %s2203_s12 = smov 0   ;;  %s2205_s13 = smov 0   ;;  %s2489_s0 = inlined_call_operand.vmem [shape: bf16[2048,256], index: 0, kind: input, shape index: {}]   ;;  %s2490_s1 = inlined_call_operand.vmem [shape: bf16[256,128], index: 1, kind: input, shape index: {}]   ;;  %s2491_s2 = inlined_call_operand.vmem [shape: f32[1,128], index: 2, kind: input, shape index: {}]   ;;  %s2492_s3 = inlined_call_operand.vmem [shape: bf16[2048,128], index: 3, kind: output, shape index: {}]  }
   0x1   :  { %s2207_s14 = smov 0  }
   0x2 LB: > { %s32_s15 = sadd.s32 1, %s2176_s13  ;;  %p1580_p0 = scmp.ge.s32.totalorder %s2180_s14, 1  ;;  %s2180_s14 = sphi %s2207_s14, %s13_s14   ;;  %s2176_s13 = sphi %s2205_s13, %s2494_s13   ;;  %s2172_s12 = sphi %s2203_s12, %s2493_s12  }
   0x3   : > { %p34_p1 = scmp.ge.s32.totalorder %s32_s15, 4  ;;  %p191_p2 = scmp.lt.s32.totalorder %s2180_s14, 5 }
   0x5   : > { %s2496_s15 = smov (%p34_p1, %s32_s15), 0  ;;  %p192_p3 = pnand %p1580_p0, %p191_p2 }
   0x6   : > { %v2046_v0 = vld [vmem:[%s2490_s1] sm:$0xff] (!%p192_p3)   ;;  %v2182_v1 = vmov (!%p192_p3), 0   ;;  %s1581_s18 = sshll.u32 (!%p192_p3), %s2172_s12, 6  ;;  %v2047_v2 = vld [vmem:[%s2490_s1 + $0x8] sm:$0xff] (!%p192_p3)   ;;  %v2048_v3 = vld [vmem:[%s2490_s1 + $0x10] sm:$0xff] (!%p192_p3)  }
   0x7   : > { %195 = sbr.rel (%p192_p3) target bundleno = 412 (0x19c), region = 32  ;;  %787 = vmatprep.subr.bf16.mxu0 (!%p192_p3), %v2182_v1  ;;  %1989 = vmatprep.subr.bf16.mxu1 (!%p192_p3), %v2182_v1  ;;  %p236_p4 = scmp.lt.s32.totalorder (!%p192_p3), %s1581_s18, 255  ;;  %v2049_v4 = vld [vmem:[%s2490_s1 + $0x18] sm:$0xff] (!%p192_p3)   ;;  %v2050_v5 = vld [vmem:[%s2490_s1 + $0x20] sm:$0xff] (!%p192_p3)   ;;  %v2051_v7 = vld [vmem:[%s2490_s1 + $0x28] sm:$0xff] (!%p192_p3)  }
   0x8   : > { %788 = vmatpush1.bf16.msra.mxu0 (!%p192_p3), %v2046_v0  ;;  %2005 = vmatpush1.bf16.msra.mxu1 (!%p192_p3), %v2046_v0  ;;  %v2052_v9 = vld [vmem:[%s2490_s1 + $0x30] sm:$0xff] (!%p192_p3)   ;;  %v2053_v10 = vld [vmem:[%s2490_s1 + $0x38] sm:$0xff] (!%p192_p3)   ;;  %v2054_v11 = vld [vmem:[%s2490_s1 + $0x40] sm:$0xff] (!%p192_p3)  }
   0x9   : > { %789 = vmatprep.subr.bf16.mxu0 (!%p192_p3), %v2182_v1  ;;  %1990 = vmatprep.subr.bf16.mxu1 (!%p192_p3), %v2182_v1  ;;  %v2055_v12 = vld [vmem:[%s2490_s1 + $0x48] sm:$0xff] (!%p192_p3)   ;;  %v2056_v13 = vld [vmem:[%s2490_s1 + $0x50] sm:$0xff] (!%p192_p3)   ;;  %v2057_v14 = vld [vmem:[%s2490_s1 + $0x58] sm:$0xff] (!%p192_p3)  }
   0xa   : > { %v2058_v15 = vld [vmem:[%s2490_s1 + $0x60] sm:$0xff] (!%p192_p3)   ;;  %v2059_v16 = vld [vmem:[%s2490_s1 + $0x68] sm:$0xff] (!%p192_p3)   ;;  %v2060_v17 = vld [vmem:[%s2490_s1 + $0x70] sm:$0xff] (!%p192_p3)  }
   0xb   : > { %v2061_v18 = vld [vmem:[%s2490_s1 + $0x78] sm:$0xff] (!%p192_p3)  }
   0xc   : > { %790 = vmatpush1.bf16.msra.mxu0 (!%p192_p3), %v2047_v2  ;;  %2006 = vmatpush1.bf16.msra.mxu1 (!%p192_p3), %v2047_v2 }
   0xd   : > { %791 = vmatprep.subr.bf16.mxu0 (!%p192_p3), %v2182_v1  ;;  %1991 = vmatprep.subr.bf16.mxu1 (!%p192_p3), %v2182_v1 }
   0xe   : > { %s2498_s18 = smov (!%p236_p4, %s1581_s18), 255 }
   0xf   : > { %s1733_s25 = sshll.u32 %s2498_s18, 3  ;;  %s1585_s6 = sshll.u32 %s2498_s18, 2 }
  0x10   : > { %792 = vmatpush1.bf16.msra.mxu0 %v2048_v3  ;;  %2007 = vmatpush1.bf16.msra.mxu1 %v2048_v3  ;;  %s2250_s30 = scalar_lea.vmem %s2489_s0, %s1733_s25  ;;  %s2386_s8 = scalar_lea.vmem %s2492_s3, %s1585_s6 }
  0x11   : > { %793 = vmatprep.subr.bf16.mxu0 %v2182_v1  ;;  %1992 = vmatprep.subr.bf16.mxu1 %v2182_v1  ;;  %v2064_v6 = vld [vmem:[%s2250_s30 + $0x4] ss:$8 sps:$4 sm:$0xff]   ;;  %v2062_v19 = vld [vmem:[%s2250_s30] ss:$8 sps:$4 sm:$0xff]   ;;  %v2068_v21 = vld [vmem:[%s2250_s30 + $0x14] ss:$8 sps:$4 sm:$0xff]  }
  0x12   : > { %v2067_v8 = vld [vmem:[%s2250_s30 + $0x104] ss:$8 sps:$4 sm:$0xff]   ;;  %819 = vmatprep.mubr.bf16.mxu0 %v2064_v6  ;;  %v2065_v20 = vld [vmem:[%s2250_s30 + $0x100] ss:$8 sps:$4 sm:$0xff]   ;;  %v2070_v22 = vld [vmem:[%s2250_s30 + $0x114] ss:$8 sps:$4 sm:$0xff]  }
  0x13   : > { %947 = vmatprep.mubr.bf16.mxu1 %v2067_v8  ;;  %v2072_v23 = vld [vmem:[%s2250_s30 + $0x10] ss:$8 sps:$4 sm:$0xff]   ;;  %v2074_v25 = vld [vmem:[%s2250_s30 + $0x24] ss:$8 sps:$4 sm:$0xff]   ;;  %v2078_v27 = vld [vmem:[%s2250_s30 + $0x20] ss:$8 sps:$4 sm:$0xff]  }
  0x14   : > { %794 = vmatpush1.bf16.msra.mxu0 %v2049_v4  ;;  %2008 = vmatpush1.bf16.msra.mxu1 %v2049_v4  ;;  %v2073_v24 = vld [vmem:[%s2250_s30 + $0x110] ss:$8 sps:$4 sm:$0xff]   ;;  %v2076_v26 = vld [vmem:[%s2250_s30 + $0x124] ss:$8 sps:$4 sm:$0xff]   ;;  %v2079_v28 = vld [vmem:[%s2250_s30 + $0x120] ss:$8 sps:$4 sm:$0xff]  }
  0x15   : > { %795 = vmatprep.subr.bf16.mxu0 %v2182_v1  ;;  %1993 = vmatprep.subr.bf16.mxu1 %v2182_v1  ;;  %v2080_v29 = vld [vmem:[%s2250_s30 + $0x34] ss:$8 sps:$4 sm:$0xff]   ;;  %v2084_v31 = vld [vmem:[%s2250_s30 + $0x30] ss:$8 sps:$4 sm:$0xff]   ;;  %v2086_v33 = vld [vmem:[%s2250_s30 + $0x44] ss:$8 sps:$4 sm:$0xff]  }
  0x16   : > { %v2082_v30 = vld [vmem:[%s2250_s30 + $0x134] ss:$8 sps:$4 sm:$0xff]   ;;  %v2085_v32 = vld [vmem:[%s2250_s30 + $0x130] ss:$8 sps:$4 sm:$0xff]   ;;  %v2088_v34 = vld [vmem:[%s2250_s30 + $0x144] ss:$8 sps:$4 sm:$0xff]  }
  0x17   : > { %v2090_v35 = vld [vmem:[%s2250_s30 + $0x40] ss:$8 sps:$4 sm:$0xff]   ;;  %v2092_v37 = vld [vmem:[%s2250_s30 + $0x54] ss:$8 sps:$4 sm:$0xff]   ;;  %v2096_v39 = vld [vmem:[%s2250_s30 + $0x50] ss:$8 sps:$4 sm:$0xff]  }
  0x18   : > { %796 = vmatpush1.bf16.msra.mxu0 %v2050_v5  ;;  %2009 = vmatpush1.bf16.msra.mxu1 %v2050_v5  ;;  %v2091_v36 = vld [vmem:[%s2250_s30 + $0x140] ss:$8 sps:$4 sm:$0xff]   ;;  %v2094_v38 = vld [vmem:[%s2250_s30 + $0x154] ss:$8 sps:$4 sm:$0xff]   ;;  %v2097_v40 = vld [vmem:[%s2250_s30 + $0x150] ss:$8 sps:$4 sm:$0xff]  }
  0x19   : > { %797 = vmatprep.subr.bf16.mxu0 %v2182_v1  ;;  %1994 = vmatprep.subr.bf16.mxu1 %v2182_v1  ;;  %v2098_v41 = vld [vmem:[%s2250_s30 + $0x64] ss:$8 sps:$4 sm:$0xff]   ;;  %v2102_v43 = vld [vmem:[%s2250_s30 + $0x60] ss:$8 sps:$4 sm:$0xff]   ;;  %v2104_v45 = vld [vmem:[%s2250_s30 + $0x74] ss:$8 sps:$4 sm:$0xff]  }
  0x1a   : > { %v2100_v42 = vld [vmem:[%s2250_s30 + $0x164] ss:$8 sps:$4 sm:$0xff]   ;;  %v2103_v44 = vld [vmem:[%s2250_s30 + $0x160] ss:$8 sps:$4 sm:$0xff]   ;;  %v2106_v46 = vld [vmem:[%s2250_s30 + $0x174] ss:$8 sps:$4 sm:$0xff]  }
  0x1b   : > { %v2108_v47 = vld [vmem:[%s2250_s30 + $0x70] ss:$8 sps:$4 sm:$0xff]   ;;  %v2110_v49 = vld [vmem:[%s2250_s30 + $0x84] ss:$8 sps:$4 sm:$0xff]   ;;  %v2114_v51 = vld [vmem:[%s2250_s30 + $0x80] ss:$8 sps:$4 sm:$0xff]  }
  0x1c   : > { %798 = vmatpush1.bf16.msra.mxu0 %v2051_v7  ;;  %2010 = vmatpush1.bf16.msra.mxu1 %v2051_v7  ;;  %v2109_v48 = vld [vmem:[%s2250_s30 + $0x170] ss:$8 sps:$4 sm:$0xff]   ;;  %v2112_v50 = vld [vmem:[%s2250_s30 + $0x184] ss:$8 sps:$4 sm:$0xff]   ;;  %v2115_v52 = vld [vmem:[%s2250_s30 + $0x180] ss:$8 sps:$4 sm:$0xff]  }
  0x1d   : > { %799 = vmatprep.subr.bf16.mxu0 %v2182_v1  ;;  %1995 = vmatprep.subr.bf16.mxu1 %v2182_v1  ;;  %v2116_v53 = vld [vmem:[%s2250_s30 + $0x94] ss:$8 sps:$4 sm:$0xff]   ;;  %v2120_v55 = vld [vmem:[%s2250_s30 + $0x90] ss:$8 sps:$4 sm:$0xff]   ;;  %v2122_v57 = vld [vmem:[%s2250_s30 + $0xa4] ss:$8 sps:$4 sm:$0xff]  }
  0x1e   : > { %v2118_v54 = vld [vmem:[%s2250_s30 + $0x194] ss:$8 sps:$4 sm:$0xff]   ;;  %v2121_v56 = vld [vmem:[%s2250_s30 + $0x190] ss:$8 sps:$4 sm:$0xff]   ;;  %v2124_v58 = vld [vmem:[%s2250_s30 + $0x1a4] ss:$8 sps:$4 sm:$0xff]  }
  0x1f   : > { %v2126_v59 = vld [vmem:[%s2250_s30 + $0xa0] ss:$8 sps:$4 sm:$0xff]   ;;  %v2128_v61 = vld [vmem:[%s2250_s30 + $0xb4] ss:$8 sps:$4 sm:$0xff]   ;;  %v2132_v63 = vld [vmem:[%s2250_s30 + $0xb0] ss:$8 sps:$4 sm:$0xff]  }
  0x20   : > { %800 = vmatpush1.bf16.msra.mxu0 %v2052_v9  ;;  %2011 = vmatpush1.bf16.msra.mxu1 %v2052_v9  ;;  %v2127_v60 = vld [vmem:[%s2250_s30 + $0x1a0] ss:$8 sps:$4 sm:$0xff]   ;;  %v2130_v62 = vld [vmem:[%s2250_s30 + $0x1b4] ss:$8 sps:$4 sm:$0xff]   ;;  %v2133_v0 = vld [vmem:[%s2250_s30 + $0x1b0] ss:$8 sps:$4 sm:$0xff]  }
  0x21   : > { %801 = vmatprep.subr.bf16.mxu0 %v2182_v1  ;;  %1996 = vmatprep.subr.bf16.mxu1 %v2182_v1  ;;  %v2136_v2 = vld [vmem:[%s2250_s30 + $0x1c4] ss:$8 sps:$4 sm:$0xff]   ;;  %v2138_v3 = vld [vmem:[%s2250_s30 + $0xc0] ss:$8 sps:$4 sm:$0xff]   ;;  %v2140_v5 = vld [vmem:[%s2250_s30 + $0xd4] ss:$8 sps:$4 sm:$0xff]  }
  0x22   : > { %v2139_v4 = vld [vmem:[%s2250_s30 + $0x1c0] ss:$8 sps:$4 sm:$0xff]   ;;  %v2142_v6 = vld [vmem:[%s2250_s30 + $0x1d4] ss:$8 sps:$4 sm:$0xff]   ;;  %v2144_v7 = vld [vmem:[%s2250_s30 + $0xd0] ss:$8 sps:$4 sm:$0xff]  }
  0x23   : > { %v2145_v8 = vld [vmem:[%s2250_s30 + $0x1d0] ss:$8 sps:$4 sm:$0xff]   ;;  %v2146_v9 = vld [vmem:[%s2250_s30 + $0xe4] ss:$8 sps:$4 sm:$0xff]  }
  0x24   : > { %802 = vmatpush1.bf16.msra.mxu0 %v2053_v10  ;;  %2012 = vmatpush1.bf16.msra.mxu1 %v2053_v10  ;;  %v2148_v10 = vld [vmem:[%s2250_s30 + $0x1e4] ss:$8 sps:$4 sm:$0xff]  }
  0x25   : > { %803 = vmatprep.subr.bf16.mxu0 %v2182_v1  ;;  %1997 = vmatprep.subr.bf16.mxu1 %v2182_v1 }
  0x28   : > { %804 = vmatpush1.bf16.msra.mxu0 %v2054_v11  ;;  %2013 = vmatpush1.bf16.msra.mxu1 %v2054_v11  ;;  %v2150_v11 = vld [vmem:[%s2250_s30 + $0xe0] ss:$8 sps:$4 sm:$0xff]  }
  0x29   : > { %805 = vmatprep.subr.bf16.mxu0 %v2182_v1  ;;  %1998 = vmatprep.subr.bf16.mxu1 %v2182_v1 }
  0x2c   : > { %806 = vmatpush1.bf16.msra.mxu0 %v2055_v12  ;;  %2014 = vmatpush1.bf16.msra.mxu1 %v2055_v12  ;;  %v2151_v12 = vld [vmem:[%s2250_s30 + $0x1e0] ss:$8 sps:$4 sm:$0xff]  }
  0x2d   : > { %807 = vmatprep.subr.bf16.mxu0 %v2182_v1  ;;  %1999 = vmatprep.subr.bf16.mxu1 %v2182_v1 }
  0x30   : > { %808 = vmatpush1.bf16.msra.mxu0 %v2056_v13  ;;  %2015 = vmatpush1.bf16.msra.mxu1 %v2056_v13  ;;  %v2152_v13 = vld [vmem:[%s2250_s30 + $0xf4] ss:$8 sps:$4 sm:$0xff]  }
  0x31   : > { %809 = vmatprep.subr.bf16.mxu0 %v2182_v1  ;;  %2000 = vmatprep.subr.bf16.mxu1 %v2182_v1 }
  0x34   : > { %810 = vmatpush1.bf16.msra.mxu0 %v2057_v14  ;;  %2016 = vmatpush1.bf16.msra.mxu1 %v2057_v14  ;;  %v2154_v14 = vld [vmem:[%s2250_s30 + $0x1f4] ss:$8 sps:$4 sm:$0xff]  }
  0x35   : > { %811 = vmatprep.subr.bf16.mxu0 %v2182_v1  ;;  %2001 = vmatprep.subr.bf16.mxu1 %v2182_v1 }
  0x38   : > { %812 = vmatpush1.bf16.msra.mxu0 %v2058_v15  ;;  %2017 = vmatpush1.bf16.msra.mxu1 %v2058_v15  ;;  %v2156_v15 = vld [vmem:[%s2250_s30 + $0xf0] ss:$8 sps:$4 sm:$0xff]  }
  0x39   : > { %813 = vmatprep.subr.bf16.mxu0 %v2182_v1  ;;  %2002 = vmatprep.subr.bf16.mxu1 %v2182_v1 }
  0x3c   : > { %814 = vmatpush1.bf16.msra.mxu0 %v2059_v16  ;;  %2018 = vmatpush1.bf16.msra.mxu1 %v2059_v16  ;;  %v2157_v16 = vld [vmem:[%s2250_s30 + $0x1f0] ss:$8 sps:$4 sm:$0xff]  }
  0x3d   : > { %815 = vmatprep.subr.bf16.mxu0 %v2182_v1  ;;  %2003 = vmatprep.subr.bf16.mxu1 %v2182_v1 }
  0x40   : > { %816 = vmatpush1.bf16.msra.mxu0 %v2060_v17  ;;  %2019 = vmatpush1.bf16.msra.mxu1 %v2060_v17  ;;  %v2376_v17 = vld [vmem:[%s2491_s2] ss:$0 sm:$0xff] }
  0x41   : > { %817 = vmatprep.subr.bf16.mxu0 %v2182_v1  ;;  %2004 = vmatprep.subr.bf16.mxu1 %v2182_v1  ;;  %v2134_v1 = vld [vmem:[%s2250_s30 + $0xc4] ss:$8 sps:$4 sm:$0xff]  }
  0x44   : > { %818 = vmatpush1.bf16.msra.mxu0 %v2061_v18  ;;  %2020 = vmatpush1.bf16.msra.mxu1 %v2061_v18 }
  0x47   : > { %820 = vmatmul.mubr.bf16.vlgmr.msra.gmra.mrb[0].mxu0 %v2062_v19  ;;  %948 = vmatmul.mubr.bf16.vlgmr.msra.gmra.mrb[0].mxu1 %v2065_v20 }
  0x48   : > { %827 = vmatprep.mubr.bf16.mxu0 %v2068_v21  ;;  %955 = vmatprep.mubr.bf16.mxu1 %v2070_v22 }
  0x4f   : > { %828 = vmatmul.mubr.bf16.gmra.mrb[4].mxu0 %v2072_v23  ;;  %956 = vmatmul.mubr.bf16.gmra.mrb[4].mxu1 %v2073_v24 }
  0x50   : > { %835 = vmatprep.mubr.bf16.mxu0 %v2074_v25  ;;  %963 = vmatprep.mubr.bf16.mxu1 %v2076_v26 }
  0x57   : > { %836 = vmatmul.mubr.bf16.gmra.mrb[8].mxu0 %v2078_v27  ;;  %964 = vmatmul.mubr.bf16.gmra.mrb[8].mxu1 %v2079_v28 }
  0x58   : > { %843 = vmatprep.mubr.bf16.mxu0 %v2080_v29  ;;  %971 = vmatprep.mubr.bf16.mxu1 %v2082_v30 }
  0x5f   : > { %844 = vmatmul.mubr.bf16.gmra.mrb[12].mxu0 %v2084_v31  ;;  %972 = vmatmul.mubr.bf16.gmra.mrb[12].mxu1 %v2085_v32 }
  0x60   : > { %851 = vmatprep.mubr.bf16.mxu0 %v2086_v33  ;;  %979 = vmatprep.mubr.bf16.mxu1 %v2088_v34 }
  0x67   : > { %852 = vmatmul.mubr.bf16.gmra.mrb[16].mxu0 %v2090_v35  ;;  %980 = vmatmul.mubr.bf16.gmra.mrb[16].mxu1 %v2091_v36 }
  0x68   : > { %859 = vmatprep.mubr.bf16.mxu0 %v2092_v37  ;;  %987 = vmatprep.mubr.bf16.mxu1 %v2094_v38 }
  0x6f   : > { %860 = vmatmul.mubr.bf16.gmra.mrb[20].mxu0 %v2096_v39  ;;  %988 = vmatmul.mubr.bf16.gmra.mrb[20].mxu1 %v2097_v40 }
  0x70   : > { %867 = vmatprep.mubr.bf16.mxu0 %v2098_v41  ;;  %995 = vmatprep.mubr.bf16.mxu1 %v2100_v42 }
  0x77   : > { %868 = vmatmul.mubr.bf16.gmra.mrb[24].mxu0 %v2102_v43  ;;  %996 = vmatmul.mubr.bf16.gmra.mrb[24].mxu1 %v2103_v44 }
  0x78   : > { %875 = vmatprep.mubr.bf16.mxu0 %v2104_v45  ;;  %1003 = vmatprep.mubr.bf16.mxu1 %v2106_v46 }
  0x7f   : > { %876 = vmatmul.mubr.bf16.gmra.mrb[28].mxu0 %v2108_v47  ;;  %1004 = vmatmul.mubr.bf16.gmra.mrb[28].mxu1 %v2109_v48 }
  0x80   : > { %883 = vmatprep.mubr.bf16.mxu0 %v2110_v49  ;;  %1011 = vmatprep.mubr.bf16.mxu1 %v2112_v50 }
  0x87   : > { %884 = vmatmul.mubr.bf16.gmra.mrb[32].mxu0 %v2114_v51  ;;  %1012 = vmatmul.mubr.bf16.gmra.mrb[32].mxu1 %v2115_v52 }
  0x88   : > { %891 = vmatprep.mubr.bf16.mxu0 %v2116_v53  ;;  %1019 = vmatprep.mubr.bf16.mxu1 %v2118_v54 }
  0x8f   : > { %892 = vmatmul.mubr.bf16.gmra.mrb[36].mxu0 %v2120_v55  ;;  %1020 = vmatmul.mubr.bf16.gmra.mrb[36].mxu1 %v2121_v56 }
  0x90   : > { %899 = vmatprep.mubr.bf16.mxu0 %v2122_v57  ;;  %1027 = vmatprep.mubr.bf16.mxu1 %v2124_v58 }
  0x97   : > { %900 = vmatmul.mubr.bf16.gmra.mrb[40].mxu0 %v2126_v59  ;;  %1028 = vmatmul.mubr.bf16.gmra.mrb[40].mxu1 %v2127_v60 }
  0x98   : > { %907 = vmatprep.mubr.bf16.mxu0 %v2128_v61  ;;  %1035 = vmatprep.mubr.bf16.mxu1 %v2130_v62 }
  0x9f   : > { %908 = vmatmul.mubr.bf16.gmra.mrb[44].mxu0 %v2132_v63  ;;  %1036 = vmatmul.mubr.bf16.gmra.mrb[44].mxu1 %v2133_v0 }
  0xa0   : > { %915 = vmatprep.mubr.bf16.mxu0 %v2134_v1  ;;  %1043 = vmatprep.mubr.bf16.mxu1 %v2136_v2 }
  0xa7   : > { %916 = vmatmul.mubr.bf16.gmra.mrb[48].mxu0 %v2138_v3  ;;  %1044 = vmatmul.mubr.bf16.gmra.mrb[48].mxu1 %v2139_v4 }
  0xa8   : > { %923 = vmatprep.mubr.bf16.mxu0 %v2140_v5  ;;  %1051 = vmatprep.mubr.bf16.mxu1 %v2142_v6 }
  0xaf   : > { %924 = vmatmul.mubr.bf16.gmra.mrb[52].mxu0 %v2144_v7  ;;  %1052 = vmatmul.mubr.bf16.gmra.mrb[52].mxu1 %v2145_v8 }
  0xb0   : > { %931 = vmatprep.mubr.bf16.mxu0 %v2146_v9  ;;  %1059 = vmatprep.mubr.bf16.mxu1 %v2148_v10 }
  0xb7   : > { %932 = vmatmul.mubr.bf16.gmra.mrb[56].mxu0 %v2150_v11  ;;  %1060 = vmatmul.mubr.bf16.gmra.mrb[56].mxu1 %v2151_v12 }
  0xb8   : > { %939 = vmatprep.mubr.bf16.mxu0 %v2152_v13  ;;  %1067 = vmatprep.mubr.bf16.mxu1 %v2154_v14 }
  0xbf   : > { %940 = vmatmul.mubr.bf16.gmra.mrb[60].mxu0 %v2156_v15  ;;  %1068 = vmatmul.mubr.bf16.gmra.mrb[60].mxu1 %v2157_v16 }
 0x11a   : > { %v821_v18 = vpop.f32.mrb[0].mxu0  ;;  %v949_v19 = vpop.f32.mrb[0].mxu1 }
 0x11b   : > { %v822_v20 = vadd.f32 %v2376_v17, %v821_v18  ;;  %v950_v21 = vadd.f32 %v2376_v17, %v949_v19  ;;  %v823_v22 = vpop.f32.mrb[1].mxu0  ;;  %v951_v23 = vpop.f32.mrb[1].mxu1 }
 0x11c   : > { %v824_v24 = vpop.f32.mrb[2].mxu0  ;;  %v952_v25 = vpop.f32.mrb[2].mxu1 }
 0x11d   : > { %v825_v26 = vadd.f32 %v2376_v17, %v824_v24  ;;  %v953_v27 = vadd.f32 %v2376_v17, %v952_v25  ;;  %v826_v28 = vpop.f32.mrb[3].mxu0  ;;  %v954_v29 = vpop.f32.mrb[3].mxu1  ;;  %v1076_v30 = vmax.f32 %v822_v20, 0.0  ;;  %v1108_v31 = vmax.f32 %v950_v21, 0.0 }
 0x11f   : > { %v1077_v32 = vmax.f32 %v825_v26, 0.0  ;;  %v1109_v33 = vmax.f32 %v953_v27, 0.0 }
 0x121   : > { %v1801_v34 = vpack.c.bf16 %v1077_v32, %v1076_v30  ;;  %v1881_v35 = vpack.c.bf16 %v1109_v33, %v1108_v31 }
 0x122   : > { %v829_v36 = vpop.f32.mrb[4].mxu0  ;;  %v957_v37 = vpop.f32.mrb[4].mxu1 }
 0x123   : > { %1802 = vst [vmem:[%s2386_s8] sm:$0xff] %v1801_v34   ;;  %1973 = vst [vmem:[%s2386_s8 + $0x80] sm:$0xff] %v1881_v35   ;;  %v830_v38 = vadd.f32 %v2376_v17, %v829_v36  ;;  %v958_v39 = vadd.f32 %v2376_v17, %v957_v37  ;;  %v831_v40 = vpop.f32.mrb[5].mxu0  ;;  %v959_v41 = vpop.f32.mrb[5].mxu1 }
 0x124   : > { %v832_v42 = vpop.f32.mrb[6].mxu0  ;;  %v960_v43 = vpop.f32.mrb[6].mxu1 }
 0x125   : > { %v833_v44 = vadd.f32 %v2376_v17, %v832_v42  ;;  %v961_v45 = vadd.f32 %v2376_v17, %v960_v43  ;;  %v834_v46 = vpop.f32.mrb[7].mxu0  ;;  %v962_v47 = vpop.f32.mrb[7].mxu1  ;;  %v1078_v48 = vmax.f32 %v830_v38, 0.0  ;;  %v1110_v49 = vmax.f32 %v958_v39, 0.0 }
 0x127   : > { %v1079_v50 = vmax.f32 %v833_v44, 0.0  ;;  %v1111_v51 = vmax.f32 %v961_v45, 0.0 }
 0x129   : > { %v1806_v52 = vpack.c.bf16 %v1079_v50, %v1078_v48  ;;  %v1886_v53 = vpack.c.bf16 %v1111_v51, %v1110_v49 }
 0x12a   : > { %v837_v54 = vpop.f32.mrb[8].mxu0  ;;  %v965_v55 = vpop.f32.mrb[8].mxu1 }
 0x12b   : > { %1958 = vst [vmem:[%s2386_s8 + $0x8] sm:$0xff] %v1806_v52   ;;  %1974 = vst [vmem:[%s2386_s8 + $0x88] sm:$0xff] %v1886_v53   ;;  %v838_v56 = vadd.f32 %v2376_v17, %v837_v54  ;;  %v966_v57 = vadd.f32 %v2376_v17, %v965_v55  ;;  %v839_v58 = vpop.f32.mrb[9].mxu0  ;;  %v967_v59 = vpop.f32.mrb[9].mxu1 }
 0x12c   : > { %v840_v60 = vpop.f32.mrb[10].mxu0  ;;  %v968_v61 = vpop.f32.mrb[10].mxu1 }
 0x12d   : > { %v841_v62 = vadd.f32 %v2376_v17, %v840_v60  ;;  %v969_v63 = vadd.f32 %v2376_v17, %v968_v61  ;;  %v842_v0 = vpop.f32.mrb[11].mxu0  ;;  %v970_v1 = vpop.f32.mrb[11].mxu1  ;;  %v1080_v2 = vmax.f32 %v838_v56, 0.0  ;;  %v1112_v3 = vmax.f32 %v966_v57, 0.0 }
 0x12f   : > { %v1081_v4 = vmax.f32 %v841_v62, 0.0  ;;  %v1113_v5 = vmax.f32 %v969_v63, 0.0 }
 0x131   : > { %v1811_v6 = vpack.c.bf16 %v1081_v4, %v1080_v2  ;;  %v1891_v7 = vpack.c.bf16 %v1113_v5, %v1112_v3 }
 0x132   : > { %v845_v8 = vpop.f32.mrb[12].mxu0  ;;  %v973_v9 = vpop.f32.mrb[12].mxu1 }
 0x133   : > { %1959 = vst [vmem:[%s2386_s8 + $0x10] sm:$0xff] %v1811_v6   ;;  %1975 = vst [vmem:[%s2386_s8 + $0x90] sm:$0xff] %v1891_v7   ;;  %v846_v10 = vadd.f32 %v2376_v17, %v845_v8  ;;  %v974_v11 = vadd.f32 %v2376_v17, %v973_v9  ;;  %v847_v12 = vpop.f32.mrb[13].mxu0  ;;  %v975_v13 = vpop.f32.mrb[13].mxu1 }
 0x134   : > { %v848_v14 = vpop.f32.mrb[14].mxu0  ;;  %v976_v15 = vpop.f32.mrb[14].mxu1 }
 0x135   : > { %v849_v16 = vadd.f32 %v2376_v17, %v848_v14  ;;  %v977_v18 = vadd.f32 %v2376_v17, %v976_v15  ;;  %v850_v19 = vpop.f32.mrb[15].mxu0  ;;  %v978_v20 = vpop.f32.mrb[15].mxu1  ;;  %v1082_v21 = vmax.f32 %v846_v10, 0.0  ;;  %v1114_v22 = vmax.f32 %v974_v11, 0.0 }
 0x137   : > { %v1083_v23 = vmax.f32 %v849_v16, 0.0  ;;  %v1115_v24 = vmax.f32 %v977_v18, 0.0 }
 0x139   : > { %v1816_v25 = vpack.c.bf16 %v1083_v23, %v1082_v21  ;;  %v1896_v26 = vpack.c.bf16 %v1115_v24, %v1114_v22 }
 0x13a   : > { %v853_v27 = vpop.f32.mrb[16].mxu0  ;;  %v981_v28 = vpop.f32.mrb[16].mxu1 }
 0x13b   : > { %1960 = vst [vmem:[%s2386_s8 + $0x18] sm:$0xff] %v1816_v25   ;;  %1976 = vst [vmem:[%s2386_s8 + $0x98] sm:$0xff] %v1896_v26   ;;  %v854_v29 = vadd.f32 %v2376_v17, %v853_v27  ;;  %v982_v30 = vadd.f32 %v2376_v17, %v981_v28  ;;  %v855_v31 = vpop.f32.mrb[17].mxu0  ;;  %v983_v32 = vpop.f32.mrb[17].mxu1 }
 0x13c   : > { %v856_v33 = vpop.f32.mrb[18].mxu0  ;;  %v984_v34 = vpop.f32.mrb[18].mxu1 }
 0x13d   : > { %v857_v35 = vadd.f32 %v2376_v17, %v856_v33  ;;  %v985_v36 = vadd.f32 %v2376_v17, %v984_v34  ;;  %v858_v37 = vpop.f32.mrb[19].mxu0  ;;  %v986_v38 = vpop.f32.mrb[19].mxu1  ;;  %v1084_v39 = vmax.f32 %v854_v29, 0.0  ;;  %v1116_v40 = vmax.f32 %v982_v30, 0.0 }
 0x13f   : > { %v1085_v41 = vmax.f32 %v857_v35, 0.0  ;;  %v1117_v42 = vmax.f32 %v985_v36, 0.0 }
 0x141   : > { %v1821_v43 = vpack.c.bf16 %v1085_v41, %v1084_v39  ;;  %v1901_v44 = vpack.c.bf16 %v1117_v42, %v1116_v40 }
 0x142   : > { %v861_v45 = vpop.f32.mrb[20].mxu0  ;;  %v989_v46 = vpop.f32.mrb[20].mxu1 }
 0x143   : > { %1961 = vst [vmem:[%s2386_s8 + $0x20] sm:$0xff] %v1821_v43   ;;  %1977 = vst [vmem:[%s2386_s8 + $0xa0] sm:$0xff] %v1901_v44   ;;  %v862_v47 = vadd.f32 %v2376_v17, %v861_v45  ;;  %v990_v48 = vadd.f32 %v2376_v17, %v989_v46  ;;  %v863_v49 = vpop.f32.mrb[21].mxu0  ;;  %v991_v50 = vpop.f32.mrb[21].mxu1 }
 0x144   : > { %v864_v51 = vpop.f32.mrb[22].mxu0  ;;  %v992_v52 = vpop.f32.mrb[22].mxu1 }
 0x145   : > { %v865_v53 = vadd.f32 %v2376_v17, %v864_v51  ;;  %v993_v54 = vadd.f32 %v2376_v17, %v992_v52  ;;  %v866_v55 = vpop.f32.mrb[23].mxu0  ;;  %v994_v56 = vpop.f32.mrb[23].mxu1  ;;  %v1086_v57 = vmax.f32 %v862_v47, 0.0  ;;  %v1118_v58 = vmax.f32 %v990_v48, 0.0 }
 0x147   : > { %v1087_v59 = vmax.f32 %v865_v53, 0.0  ;;  %v1119_v60 = vmax.f32 %v993_v54, 0.0 }
 0x149   : > { %v1826_v61 = vpack.c.bf16 %v1087_v59, %v1086_v57  ;;  %v1906_v62 = vpack.c.bf16 %v1119_v60, %v1118_v58 }
 0x14a   : > { %v869_v63 = vpop.f32.mrb[24].mxu0  ;;  %v997_v0 = vpop.f32.mrb[24].mxu1 }
 0x14b   : > { %1962 = vst [vmem:[%s2386_s8 + $0x28] sm:$0xff] %v1826_v61   ;;  %1978 = vst [vmem:[%s2386_s8 + $0xa8] sm:$0xff] %v1906_v62   ;;  %v870_v1 = vadd.f32 %v2376_v17, %v869_v63  ;;  %v998_v2 = vadd.f32 %v2376_v17, %v997_v0  ;;  %v871_v3 = vpop.f32.mrb[25].mxu0  ;;  %v999_v4 = vpop.f32.mrb[25].mxu1 }
 0x14c   : > { %v872_v5 = vpop.f32.mrb[26].mxu0  ;;  %v1000_v6 = vpop.f32.mrb[26].mxu1 }
 0x14d   : > { %v873_v7 = vadd.f32 %v2376_v17, %v872_v5  ;;  %v1001_v8 = vadd.f32 %v2376_v17, %v1000_v6  ;;  %v874_v9 = vpop.f32.mrb[27].mxu0  ;;  %v1002_v10 = vpop.f32.mrb[27].mxu1  ;;  %v1088_v11 = vmax.f32 %v870_v1, 0.0  ;;  %v1120_v12 = vmax.f32 %v998_v2, 0.0 }
 0x14f   : > { %v1089_v13 = vmax.f32 %v873_v7, 0.0  ;;  %v1121_v14 = vmax.f32 %v1001_v8, 0.0 }
 0x151   : > { %v1831_v15 = vpack.c.bf16 %v1089_v13, %v1088_v11  ;;  %v1911_v16 = vpack.c.bf16 %v1121_v14, %v1120_v12 }
 0x152   : > { %v877_v18 = vpop.f32.mrb[28].mxu0  ;;  %v1005_v19 = vpop.f32.mrb[28].mxu1 }
 0x153   : > { %1963 = vst [vmem:[%s2386_s8 + $0x30] sm:$0xff] %v1831_v15   ;;  %1979 = vst [vmem:[%s2386_s8 + $0xb0] sm:$0xff] %v1911_v16   ;;  %v878_v20 = vadd.f32 %v2376_v17, %v877_v18  ;;  %v1006_v21 = vadd.f32 %v2376_v17, %v1005_v19  ;;  %v879_v22 = vpop.f32.mrb[29].mxu0  ;;  %v1007_v23 = vpop.f32.mrb[29].mxu1 }
 0x154   : > { %v880_v24 = vpop.f32.mrb[30].mxu0  ;;  %v1008_v25 = vpop.f32.mrb[30].mxu1 }
 0x155   : > { %v881_v26 = vadd.f32 %v2376_v17, %v880_v24  ;;  %v1009_v27 = vadd.f32 %v2376_v17, %v1008_v25  ;;  %v882_v28 = vpop.f32.mrb[31].mxu0  ;;  %v1010_v29 = vpop.f32.mrb[31].mxu1  ;;  %v1090_v30 = vmax.f32 %v878_v20, 0.0  ;;  %v1122_v31 = vmax.f32 %v1006_v21, 0.0 }
 0x157   : > { %v1091_v32 = vmax.f32 %v881_v26, 0.0  ;;  %v1123_v33 = vmax.f32 %v1009_v27, 0.0 }
 0x159   : > { %v1836_v34 = vpack.c.bf16 %v1091_v32, %v1090_v30  ;;  %v1916_v35 = vpack.c.bf16 %v1123_v33, %v1122_v31 }
 0x15a   : > { %v885_v36 = vpop.f32.mrb[32].mxu0  ;;  %v1013_v37 = vpop.f32.mrb[32].mxu1 }
 0x15b   : > { %1964 = vst [vmem:[%s2386_s8 + $0x38] sm:$0xff] %v1836_v34   ;;  %1980 = vst [vmem:[%s2386_s8 + $0xb8] sm:$0xff] %v1916_v35   ;;  %v886_v38 = vadd.f32 %v2376_v17, %v885_v36  ;;  %v1014_v39 = vadd.f32 %v2376_v17, %v1013_v37  ;;  %v887_v40 = vpop.f32.mrb[33].mxu0  ;;  %v1015_v41 = vpop.f32.mrb[33].mxu1 }
 0x15c   : > { %v888_v42 = vpop.f32.mrb[34].mxu0  ;;  %v1016_v43 = vpop.f32.mrb[34].mxu1 }
 0x15d   : > { %v889_v44 = vadd.f32 %v2376_v17, %v888_v42  ;;  %v1017_v45 = vadd.f32 %v2376_v17, %v1016_v43  ;;  %v890_v46 = vpop.f32.mrb[35].mxu0  ;;  %v1018_v47 = vpop.f32.mrb[35].mxu1  ;;  %v1092_v48 = vmax.f32 %v886_v38, 0.0  ;;  %v1124_v49 = vmax.f32 %v1014_v39, 0.0 }
 0x15f   : > { %v1093_v50 = vmax.f32 %v889_v44, 0.0  ;;  %v1125_v51 = vmax.f32 %v1017_v45, 0.0 }
 0x161   : > { %v1841_v52 = vpack.c.bf16 %v1093_v50, %v1092_v48  ;;  %v1921_v53 = vpack.c.bf16 %v1125_v51, %v1124_v49 }
 0x162   : > { %v893_v54 = vpop.f32.mrb[36].mxu0  ;;  %v1021_v55 = vpop.f32.mrb[36].mxu1 }
 0x163   : > { %1965 = vst [vmem:[%s2386_s8 + $0x40] sm:$0xff] %v1841_v52   ;;  %1981 = vst [vmem:[%s2386_s8 + $0xc0] sm:$0xff] %v1921_v53   ;;  %v894_v56 = vadd.f32 %v2376_v17, %v893_v54  ;;  %v1022_v57 = vadd.f32 %v2376_v17, %v1021_v55  ;;  %v895_v58 = vpop.f32.mrb[37].mxu0  ;;  %v1023_v59 = vpop.f32.mrb[37].mxu1 }
 0x164   : > { %v896_v60 = vpop.f32.mrb[38].mxu0  ;;  %v1024_v61 = vpop.f32.mrb[38].mxu1 }
 0x165   : > { %v897_v62 = vadd.f32 %v2376_v17, %v896_v60  ;;  %v1025_v63 = vadd.f32 %v2376_v17, %v1024_v61  ;;  %v898_v0 = vpop.f32.mrb[39].mxu0  ;;  %v1026_v1 = vpop.f32.mrb[39].mxu1  ;;  %v1094_v2 = vmax.f32 %v894_v56, 0.0  ;;  %v1126_v3 = vmax.f32 %v1022_v57, 0.0 }
 0x167   : > { %v1095_v4 = vmax.f32 %v897_v62, 0.0  ;;  %v1127_v5 = vmax.f32 %v1025_v63, 0.0 }
 0x169   : > { %v1846_v6 = vpack.c.bf16 %v1095_v4, %v1094_v2  ;;  %v1926_v7 = vpack.c.bf16 %v1127_v5, %v1126_v3 }
 0x16a   : > { %v901_v8 = vpop.f32.mrb[40].mxu0  ;;  %v1029_v9 = vpop.f32.mrb[40].mxu1 }
 0x16b   : > { %1966 = vst [vmem:[%s2386_s8 + $0x48] sm:$0xff] %v1846_v6   ;;  %1982 = vst [vmem:[%s2386_s8 + $0xc8] sm:$0xff] %v1926_v7   ;;  %v902_v10 = vadd.f32 %v2376_v17, %v901_v8  ;;  %v1030_v11 = vadd.f32 %v2376_v17, %v1029_v9  ;;  %v903_v12 = vpop.f32.mrb[41].mxu0  ;;  %v1031_v13 = vpop.f32.mrb[41].mxu1 }
 0x16c   : > { %v904_v14 = vpop.f32.mrb[42].mxu0  ;;  %v1032_v15 = vpop.f32.mrb[42].mxu1 }
 0x16d   : > { %v905_v16 = vadd.f32 %v2376_v17, %v904_v14  ;;  %v1033_v18 = vadd.f32 %v2376_v17, %v1032_v15  ;;  %v906_v19 = vpop.f32.mrb[43].mxu0  ;;  %v1034_v20 = vpop.f32.mrb[43].mxu1  ;;  %v1096_v21 = vmax.f32 %v902_v10, 0.0  ;;  %v1128_v22 = vmax.f32 %v1030_v11, 0.0 }
 0x16f   : > { %v1097_v23 = vmax.f32 %v905_v16, 0.0  ;;  %v1129_v24 = vmax.f32 %v1033_v18, 0.0 }
 0x171   : > { %v1851_v25 = vpack.c.bf16 %v1097_v23, %v1096_v21  ;;  %v1931_v26 = vpack.c.bf16 %v1129_v24, %v1128_v22 }
 0x172   : > { %v909_v27 = vpop.f32.mrb[44].mxu0  ;;  %v1037_v28 = vpop.f32.mrb[44].mxu1 }
 0x173   : > { %1967 = vst [vmem:[%s2386_s8 + $0x50] sm:$0xff] %v1851_v25   ;;  %1983 = vst [vmem:[%s2386_s8 + $0xd0] sm:$0xff] %v1931_v26   ;;  %v910_v29 = vadd.f32 %v2376_v17, %v909_v27  ;;  %v1038_v30 = vadd.f32 %v2376_v17, %v1037_v28  ;;  %v911_v31 = vpop.f32.mrb[45].mxu0  ;;  %v1039_v32 = vpop.f32.mrb[45].mxu1 }
 0x174   : > { %v912_v33 = vpop.f32.mrb[46].mxu0  ;;  %v1040_v34 = vpop.f32.mrb[46].mxu1 }
 0x175   : > { %v913_v35 = vadd.f32 %v2376_v17, %v912_v33  ;;  %v1041_v36 = vadd.f32 %v2376_v17, %v1040_v34  ;;  %v914_v37 = vpop.f32.mrb[47].mxu0  ;;  %v1042_v38 = vpop.f32.mrb[47].mxu1  ;;  %v1098_v39 = vmax.f32 %v910_v29, 0.0  ;;  %v1130_v40 = vmax.f32 %v1038_v30, 0.0 }
 0x177   : > { %v1099_v41 = vmax.f32 %v913_v35, 0.0  ;;  %v1131_v42 = vmax.f32 %v1041_v36, 0.0 }
 0x179   : > { %v1856_v43 = vpack.c.bf16 %v1099_v41, %v1098_v39  ;;  %v1936_v44 = vpack.c.bf16 %v1131_v42, %v1130_v40 }
 0x17a   : > { %v917_v45 = vpop.f32.mrb[48].mxu0  ;;  %v1045_v46 = vpop.f32.mrb[48].mxu1 }
 0x17b   : > { %1968 = vst [vmem:[%s2386_s8 + $0x58] sm:$0xff] %v1856_v43   ;;  %1984 = vst [vmem:[%s2386_s8 + $0xd8] sm:$0xff] %v1936_v44   ;;  %v918_v47 = vadd.f32 %v2376_v17, %v917_v45  ;;  %v1046_v48 = vadd.f32 %v2376_v17, %v1045_v46  ;;  %v919_v49 = vpop.f32.mrb[49].mxu0  ;;  %v1047_v50 = vpop.f32.mrb[49].mxu1 }
 0x17c   : > { %v920_v51 = vpop.f32.mrb[50].mxu0  ;;  %v1048_v52 = vpop.f32.mrb[50].mxu1 }
 0x17d   : > { %v921_v53 = vadd.f32 %v2376_v17, %v920_v51  ;;  %v1049_v54 = vadd.f32 %v2376_v17, %v1048_v52  ;;  %v922_v55 = vpop.f32.mrb[51].mxu0  ;;  %v1050_v56 = vpop.f32.mrb[51].mxu1  ;;  %v1100_v57 = vmax.f32 %v918_v47, 0.0  ;;  %v1132_v58 = vmax.f32 %v1046_v48, 0.0 }
 0x17f   : > { %v1101_v59 = vmax.f32 %v921_v53, 0.0  ;;  %v1133_v60 = vmax.f32 %v1049_v54, 0.0 }
 0x181   : > { %v1861_v61 = vpack.c.bf16 %v1101_v59, %v1100_v57  ;;  %v1941_v62 = vpack.c.bf16 %v1133_v60, %v1132_v58 }
 0x182   : > { %v925_v63 = vpop.f32.mrb[52].mxu0  ;;  %v1053_v0 = vpop.f32.mrb[52].mxu1 }
 0x183   : > { %1969 = vst [vmem:[%s2386_s8 + $0x60] sm:$0xff] %v1861_v61   ;;  %1985 = vst [vmem:[%s2386_s8 + $0xe0] sm:$0xff] %v1941_v62   ;;  %v926_v1 = vadd.f32 %v2376_v17, %v925_v63  ;;  %v1054_v2 = vadd.f32 %v2376_v17, %v1053_v0  ;;  %v927_v3 = vpop.f32.mrb[53].mxu0  ;;  %v1055_v4 = vpop.f32.mrb[53].mxu1 }
 0x184   : > { %v928_v5 = vpop.f32.mrb[54].mxu0  ;;  %v1056_v6 = vpop.f32.mrb[54].mxu1 }
 0x185   : > { %v929_v7 = vadd.f32 %v2376_v17, %v928_v5  ;;  %v1057_v8 = vadd.f32 %v2376_v17, %v1056_v6  ;;  %v930_v9 = vpop.f32.mrb[55].mxu0  ;;  %v1058_v10 = vpop.f32.mrb[55].mxu1  ;;  %v1102_v11 = vmax.f32 %v926_v1, 0.0  ;;  %v1134_v12 = vmax.f32 %v1054_v2, 0.0 }
 0x187   : > { %v1103_v13 = vmax.f32 %v929_v7, 0.0  ;;  %v1135_v14 = vmax.f32 %v1057_v8, 0.0 }
 0x189   : > { %v1866_v15 = vpack.c.bf16 %v1103_v13, %v1102_v11  ;;  %v1946_v16 = vpack.c.bf16 %v1135_v14, %v1134_v12 }
 0x18a   : > { %v933_v18 = vpop.f32.mrb[56].mxu0  ;;  %v1061_v19 = vpop.f32.mrb[56].mxu1 }
 0x18b   : > { %1970 = vst [vmem:[%s2386_s8 + $0x68] sm:$0xff] %v1866_v15   ;;  %1986 = vst [vmem:[%s2386_s8 + $0xe8] sm:$0xff] %v1946_v16   ;;  %v934_v20 = vadd.f32 %v2376_v17, %v933_v18  ;;  %v1062_v21 = vadd.f32 %v2376_v17, %v1061_v19  ;;  %v935_v22 = vpop.f32.mrb[57].mxu0  ;;  %v1063_v23 = vpop.f32.mrb[57].mxu1 }
 0x18c   : > { %v936_v24 = vpop.f32.mrb[58].mxu0  ;;  %v1064_v25 = vpop.f32.mrb[58].mxu1 }
 0x18d   : > { %v937_v26 = vadd.f32 %v2376_v17, %v936_v24  ;;  %v1065_v27 = vadd.f32 %v2376_v17, %v1064_v25  ;;  %v938_v28 = vpop.f32.mrb[59].mxu0  ;;  %v1066_v29 = vpop.f32.mrb[59].mxu1  ;;  %v1104_v30 = vmax.f32 %v934_v20, 0.0  ;;  %v1136_v31 = vmax.f32 %v1062_v21, 0.0 }
 0x18f   : > { %v1105_v32 = vmax.f32 %v937_v26, 0.0  ;;  %v1137_v33 = vmax.f32 %v1065_v27, 0.0 }
 0x191   : > { %v1871_v34 = vpack.c.bf16 %v1105_v32, %v1104_v30  ;;  %v1951_v35 = vpack.c.bf16 %v1137_v33, %v1136_v31 }
 0x192   : > { %v941_v36 = vpop.f32.mrb[60].mxu0  ;;  %v1069_v37 = vpop.f32.mrb[60].mxu1 }
 0x193   : > { %1971 = vst [vmem:[%s2386_s8 + $0x70] sm:$0xff] %v1871_v34   ;;  %1987 = vst [vmem:[%s2386_s8 + $0xf0] sm:$0xff] %v1951_v35   ;;  %v942_v38 = vadd.f32 %v2376_v17, %v941_v36  ;;  %v1070_v39 = vadd.f32 %v2376_v17, %v1069_v37  ;;  %v943_v40 = vpop.f32.mrb[61].mxu0  ;;  %v1071_v41 = vpop.f32.mrb[61].mxu1 }
 0x194   : > { %v944_v42 = vpop.f32.mrb[62].mxu0  ;;  %v1072_v43 = vpop.f32.mrb[62].mxu1 }
 0x195   : > { %v945_v44 = vadd.f32 %v2376_v17, %v944_v42  ;;  %v1073_v45 = vadd.f32 %v2376_v17, %v1072_v43  ;;  %v946_v46 = vpop.f32.mrb[63].mxu0  ;;  %v1074_v47 = vpop.f32.mrb[63].mxu1  ;;  %v1106_v48 = vmax.f32 %v942_v38, 0.0  ;;  %v1138_v49 = vmax.f32 %v1070_v39, 0.0 }
 0x197   : > { %v1107_v50 = vmax.f32 %v945_v44, 0.0  ;;  %v1139_v51 = vmax.f32 %v1073_v45, 0.0 }
 0x199   : > { %v1876_v52 = vpack.c.bf16 %v1107_v50, %v1106_v48  ;;  %v1956_v53 = vpack.c.bf16 %v1139_v51, %v1138_v49 }
 0x19b   : > { %1972 = vst [vmem:[%s2386_s8 + $0x78] sm:$0xff] %v1876_v52   ;;  %1988 = vst [vmem:[%s2386_s8 + $0xf8] sm:$0xff] %v1956_v53  }
 0x19c PF: > { %s13_s14 = sadd.s32 1, %s2180_s14   ;;  %s2493_s12 = smov %s2176_s13 }
 0x19d   : > { %p10_p5 = scmp.ge.s32.totalorder %s13_s14, 6   ;;  %s2494_s13 = smov %s2496_s15 }
 0x19f   :  { %12 = sbr.rel (!%p10_p5) target bundleno = 2 (0x2), region = 68 }

</bundles_post_ra>
